<compile_context>
chip_gen: v5e
topology: v5e:2x2
jax: 0.10.0
libtpu: 0.0.40
codegen_flags: <defaults>
</compile_context>

<pallas_src>
import jax
import jax.numpy as jnp
from jax.experimental import pallas as pl
from jax.experimental.pallas import tpu as pltpu


def _ru(x, m):
    return (x + m - 1) // m * m


# ---------------------------------------------------------------------------
# Pallas kernels
# ---------------------------------------------------------------------------

def _mm_relu_kernel(x_ref, w_ref, b_ref, o_ref):
    # x: (tm, K) bf16, w: (K, tn) bf16, b: (1, tn) f32  -> o: (tm, tn)
    acc = jnp.dot(x_ref[...], w_ref[...], preferred_element_type=jnp.float32)
    y = jnp.maximum(acc + b_ref[...], 0.0)
    o_ref[...] = y.astype(o_ref.dtype)


def _mm_linear_kernel(x_ref, w_ref, b_ref, o_ref):
    acc = jnp.dot(x_ref[...], w_ref[...], preferred_element_type=jnp.float32)
    o_ref[...] = (acc + b_ref[...]).astype(o_ref.dtype)


def _pool_max_kernel(x_ref, o_ref):
    # x: (1, Hp, Wp, C) padded image; o: (1, Hv, Wv, C) stride-1 valid pool.
    hv, wv = o_ref.shape[1], o_ref.shape[2]
    kh = x_ref.shape[1] - hv + 1
    kw = x_ref.shape[2] - wv + 1
    x = x_ref[0]
    acc = None
    for dy in range(kh):
        for dx in range(kw):
            t = x[dy:dy + hv, dx:dx + wv, :]
            acc = t if acc is None else jnp.maximum(acc, t)
    o_ref[0] = acc.astype(o_ref.dtype)


def _pool_avg_kernel(x_ref, o_ref):
    hv, wv = o_ref.shape[1], o_ref.shape[2]
    kh = x_ref.shape[1] - hv + 1
    kw = x_ref.shape[2] - wv + 1
    x = x_ref[0]
    acc = jnp.zeros((hv, wv, x.shape[-1]), jnp.float32)
    for dy in range(kh):
        for dx in range(kw):
            acc = acc + x[dy:dy + hv, dx:dx + wv, :].astype(jnp.float32)
    o_ref[0] = (acc * (1.0 / (kh * kw))).astype(o_ref.dtype)


# ---------------------------------------------------------------------------
# Pallas wrappers
# ---------------------------------------------------------------------------

def matmul_bias_act(x2d, w2d, shift, n_out, relu=True, out_dtype=jnp.bfloat16):
    """out = act(x2d @ w2d + shift), shape exactly (M, n_out).

    w2d is pre-padded to (K, Np) with Np % 128 == 0 and shift to (1, Np) at
    parameter-construction time.  bf16 MXU operands, f32 accumulate/epilogue.
    Ragged edge tiles (M % tm, n_out % tn) are handled by Pallas masking; no
    HBM pad/slice copies around the kernel.
    """
    M, K = x2d.shape
    Kw, Np = w2d.shape
    assert K == Kw and Np % 128 == 0

    if x2d.dtype != jnp.bfloat16:
        x2d = x2d.astype(jnp.bfloat16)

    # N tile: 128 by default (keeps >=2 parallel N steps for v7x megacore and
    # small per-step weight DMAs on v5e); 256 only for the big-M early layers.
    tn = 256 if (Np % 256 == 0 and M >= 512) else 128

    # M tile: large-M early layers get 512-row tiles (x block <= ~300 KB);
    # tiny-M late layers run as a single ceil8 block (partial rows masked).
    if M >= 1024:
        tm = 512
    elif M >= 512:
        tm = 256
    elif M >= 128:
        tm = 128
    else:
        tm = _ru(M, 8)

    m_blocks = pl.cdiv(M, tm)
    n_blocks = Np // tn

    # Pick the grid loop order so the operand that would otherwise be
    # re-streamed from HBM the most stays resident across the inner axis
    # (weights for the weight-heavy late layers, activations early).
    w_bytes = K * Np * 2
    x_bytes = M * K * 2
    if w_bytes * (m_blocks - 1) > x_bytes * (n_blocks - 1):
        grid = (n_blocks, m_blocks)            # N outer, M inner
        in_specs = [
            pl.BlockSpec((tm, K), lambda j, i: (i, 0)),
            pl.BlockSpec((K, tn), lambda j, i: (0, j)),
            pl.BlockSpec((1, tn), lambda j, i: (0, j)),
        ]
        out_spec = pl.BlockSpec((tm, tn), lambda j, i: (i, j))
    else:
        grid = (m_blocks, n_blocks)            # M outer, N inner
        in_specs = [
            pl.BlockSpec((tm, K), lambda i, j: (i, 0)),
            pl.BlockSpec((K, tn), lambda i, j: (0, j)),
            pl.BlockSpec((1, tn), lambda i, j: (0, j)),
        ]
        out_spec = pl.BlockSpec((tm, tn), lambda i, j: (i, j))

    kernel = _mm_relu_kernel if relu else _mm_linear_kernel
    return pl.pallas_call(
        kernel,
        out_shape=jax.ShapeDtypeStruct((M, n_out), out_dtype),
        grid=grid,
        in_specs=in_specs,
        out_specs=out_spec,
        compiler_params=pltpu.CompilerParams(
            dimension_semantics=("parallel", "parallel")),
    )(x2d, w2d, shift)


def pool2d(x, kind, ksize=3, stride=1, padding=0):
    """3x3 max/avg pool (NHWC, bf16), window taps done in-kernel.

    The kernel computes a stride-1 "valid" pool over the (optionally zero
    padded) image; stride>1 subsamples the tiny result with an XLA slice.
    avg matches F.avg_pool2d defaults (count_include_pad=True, divisor k*k).
    NOTE: zero padding is only valid here because all max pools in this
    network use padding=0 (a padded max pool would need -inf padding).
    """
    assert not (kind == "max" and padding > 0)
    N, H, W, C = x.shape
    if padding:
        x = jnp.pad(x, ((0, 0), (padding, padding), (padding, padding), (0, 0)))
    Hp, Wp = H + 2 * padding, W + 2 * padding
    Hv, Wv = Hp - ksize + 1, Wp - ksize + 1          # stride-1 valid output

    kernel = _pool_max_kernel if kind == "max" else _pool_avg_kernel
    y = pl.pallas_call(
        kernel,
        out_shape=jax.ShapeDtypeStruct((N, Hv, Wv, C), x.dtype),
        grid=(N,),
        in_specs=[pl.BlockSpec((1, Hp, Wp, C), lambda n: (n, 0, 0, 0))],
        out_specs=pl.BlockSpec((1, Hv, Wv, C), lambda n: (n, 0, 0, 0)),
        compiler_params=pltpu.CompilerParams(dimension_semantics=("parallel",)),
    )(x)

    if stride != 1:
        y = y[:, ::stride, ::stride, :]
    return y


def basic_conv2d(x, p, stride=1, padding=0):
    """BasicConv2d: conv (bias=False) + BN(eps=1e-3) + ReLU via im2col +
    fused Pallas matmul.  x is NHWC bf16; BN scale is pre-folded into the
    (pre-padded) weight matrix and BN shift is the bias."""
    if isinstance(stride, int):
        stride = (stride, stride)
    if isinstance(padding, int):
        padding = (padding, padding)
    kh, kw, cin, cout = p["kh"], p["kw"], p["cin"], p["cout"]
    N, H, W, C = x.shape
    assert C == cin
    sh, sw = stride
    ph, pw = padding
    Ho = (H + 2 * ph - kh) // sh + 1
    Wo = (W + 2 * pw - kw) // sw + 1

    if kh == 1 and kw == 1 and (sh, sw) == (1, 1) and (ph, pw) == (0, 0):
        xcol = x.reshape(N * H * W, C)            # 1x1 conv: im2col is free
    else:
        # TODO(synk): fuse this window gather into the matmul kernel.
        xpad = jnp.pad(x, ((0, 0), (ph, ph), (pw, pw), (0, 0)))
        cols = []
        for dy in range(kh):
            for dx in range(kw):
                cols.append(xpad[:, dy:dy + sh * (Ho - 1) + 1:sh,
                                 dx:dx + sw * (Wo - 1) + 1:sw, :])
        xcol = jnp.stack(cols, axis=3).reshape(N * Ho * Wo, kh * kw * C)

    y = matmul_bias_act(xcol, p["w2d"], p["shift"], cout, relu=True,
                        out_dtype=jnp.bfloat16)
    return y.reshape(N, Ho, Wo, cout)


def conv1x1_multi(x, fp):
    """Several 1x1 BasicConv2d branches sharing the same input, fused into ONE
    Pallas matmul (weights/shifts were concatenated + padded at construction
    time); outputs are split back per branch."""
    N, H, W, C = x.shape
    y = matmul_bias_act(x.reshape(N * H * W, C), fp["w2d"], fp["shift"],
                        fp["cout"], relu=True, out_dtype=jnp.bfloat16)
    y = y.reshape(N, H, W, fp["cout"])
    outs, off = [], 0
    for c in fp["couts"]:
        outs.append(y[..., off:off + c])
        off += c
    return outs


# ---------------------------------------------------------------------------
# Deterministic parameter construction (mirrors module __init__ shapes)
# ---------------------------------------------------------------------------

class ParamGen:
    def __init__(self, seed=0):
        self.key = jax.random.PRNGKey(seed)
        self.count = 0

    def normal(self, shape, std):
        # TODO(synk): PyTorch uses trunc_normal_ init; plain normal*std is used
        # here (synthetic deterministic weights, distribution tail differs).
        self.count += 1
        k = jax.random.fold_in(self.key, self.count)
        return jax.random.normal(k, shape, jnp.float32) * std


def _pad128(a):
    n = a.shape[-1]
    npad = _ru(n, 128) - n
    if npad:
        a = jnp.pad(a, [(0, 0)] * (a.ndim - 1) + [(0, npad)])
    return a


def conv_bn(pg, cin, cout, kh, kw, std=0.1):
    """Raw (unpadded) fused conv+BN parameters."""
    w = pg.normal((kh, kw, cin, cout), std)
    gamma = jnp.ones((cout,), jnp.float32)
    beta = jnp.zeros((cout,), jnp.float32)
    rmean = jnp.zeros((cout,), jnp.float32)
    rvar = jnp.ones((cout,), jnp.float32)
    eps = 1e-3
    scale = gamma / jnp.sqrt(rvar + eps)
    shift = beta - rmean * scale
    w2d_raw = (w.reshape(kh * kw * cin, cout) * scale[None, :]).astype(jnp.bfloat16)
    return dict(w2d_raw=w2d_raw, shift_raw=shift,
                kh=kh, kw=kw, cin=cin, cout=cout)


def finalize(p):
    """Pad the output-channel dim to a multiple of 128 ONCE, at build time."""
    return dict(w2d=_pad128(p["w2d_raw"]),
                shift=_pad128(p["shift_raw"].reshape(1, -1)),
                kh=p["kh"], kw=p["kw"], cin=p["cin"], cout=p["cout"])


def fuse_1x1(plist):
    """Concatenate several 1x1 branches (same input) into one padded matmul."""
    w = jnp.concatenate([p["w2d_raw"] for p in plist], axis=1)
    s = jnp.concatenate([p["shift_raw"] for p in plist], axis=0)
    return dict(w2d=_pad128(w), shift=_pad128(s.reshape(1, -1)),
                cout=int(w.shape[1]), couts=[p["cout"] for p in plist],
                cin=plist[0]["cin"])


def incA_params(pg, cin, pool_features):
    b1 = conv_bn(pg, cin, 64, 1, 1)
    b5_1 = conv_bn(pg, cin, 48, 1, 1)
    b5_2 = conv_bn(pg, 48, 64, 5, 5)
    b3_1 = conv_bn(pg, cin, 64, 1, 1)
    b3_2 = conv_bn(pg, 64, 96, 3, 3)
    b3_3 = conv_bn(pg, 96, 96, 3, 3)
    bp = conv_bn(pg, cin, pool_features, 1, 1)
    return dict(stem=fuse_1x1([b1, b5_1, b3_1]),
                b5_2=finalize(b5_2), b3_2=finalize(b3_2),
                b3_3=finalize(b3_3), bp=finalize(bp))


def incB_params(pg, cin):
    return dict(b3=finalize(conv_bn(pg, cin, 384, 3, 3)),
                d1=finalize(conv_bn(pg, cin, 64, 1, 1)),
                d2=finalize(conv_bn(pg, 64, 96, 3, 3)),
                d3=finalize(conv_bn(pg, 96, 96, 3, 3)))


def incC_params(pg, cin, c7):
    b1 = conv_bn(pg, cin, 192, 1, 1)
    b7_1 = conv_bn(pg, cin, c7, 1, 1)
    b7_2 = conv_bn(pg, c7, c7, 1, 7)
    b7_3 = conv_bn(pg, c7, 192, 7, 1)
    bd_1 = conv_bn(pg, cin, c7, 1, 1)
    bd_2 = conv_bn(pg, c7, c7, 7, 1)
    bd_3 = conv_bn(pg, c7, c7, 1, 7)
    bd_4 = conv_bn(pg, c7, c7, 7, 1)
    bd_5 = conv_bn(pg, c7, 192, 1, 7)
    bp = conv_bn(pg, cin, 192, 1, 1)
    return dict(stem=fuse_1x1([b1, b7_1, bd_1]),
                b7_2=finalize(b7_2), b7_3=finalize(b7_3),
                bd_2=finalize(bd_2), bd_3=finalize(bd_3),
                bd_4=finalize(bd_4), bd_5=finalize(bd_5),
                bp=finalize(bp))


def incD_params(pg, cin):
    b3_1 = conv_bn(pg, cin, 192, 1, 1)
    b3_2 = conv_bn(pg, 192, 320, 3, 3)
    b7_1 = conv_bn(pg, cin, 192, 1, 1)
    b7_2 = conv_bn(pg, 192, 192, 1, 7)
    b7_3 = conv_bn(pg, 192, 192, 7, 1)
    b7_4 = conv_bn(pg, 192, 192, 3, 3)
    return dict(stem=fuse_1x1([b3_1, b7_1]),
                b3_2=finalize(b3_2), b7_2=finalize(b7_2),
                b7_3=finalize(b7_3), b7_4=finalize(b7_4))


def incE_params(pg, cin):
    b1 = conv_bn(pg, cin, 320, 1, 1)
    b3_1 = conv_bn(pg, cin, 384, 1, 1)
    b3_2a = conv_bn(pg, 384, 384, 1, 3)
    b3_2b = conv_bn(pg, 384, 384, 3, 1)
    bd_1 = conv_bn(pg, cin, 448, 1, 1)
    bd_2 = conv_bn(pg, 448, 384, 3, 3)
    bd_3a = conv_bn(pg, 384, 384, 1, 3)
    bd_3b = conv_bn(pg, 384, 384, 3, 1)
    bp = conv_bn(pg, cin, 192, 1, 1)
    return dict(stem=fuse_1x1([b1, b3_1, bd_1]),
                b3_2a=finalize(b3_2a), b3_2b=finalize(b3_2b),
                bd_2=finalize(bd_2), bd_3a=finalize(bd_3a),
                bd_3b=finalize(bd_3b), bp=finalize(bp))


def make_inception_v3_params(num_classes=16, in_chans=3, seed=0):
    pg = ParamGen(seed)
    P = {}
    P["c1a"] = finalize(conv_bn(pg, in_chans, 32, 3, 3))
    P["c2a"] = finalize(conv_bn(pg, 32, 32, 3, 3))
    P["c2b"] = finalize(conv_bn(pg, 32, 64, 3, 3))
    P["c3b"] = finalize(conv_bn(pg, 64, 80, 1, 1))
    P["c4a"] = finalize(conv_bn(pg, 80, 192, 3, 3))
    P["m5b"] = incA_params(pg, 192, 32)
    P["m5c"] = incA_params(pg, 256, 64)
    P["m5d"] = incA_params(pg, 288, 64)
    P["m6a"] = incB_params(pg, 288)
    P["m6b"] = incC_params(pg, 768, 128)
    P["m6c"] = incC_params(pg, 768, 160)
    P["m6d"] = incC_params(pg, 768, 160)
    P["m6e"] = incC_params(pg, 768, 192)
    P["m7a"] = incD_params(pg, 768)
    P["m7b"] = incE_params(pg, 1280)
    P["m7c"] = incE_params(pg, 2048)
    fcw = pg.normal((2048, num_classes), 0.1).astype(jnp.bfloat16)
    # TODO(synk): PyTorch Linear bias uses uniform fan-in init; zeros used here.
    P["fc"] = dict(w2d=_pad128(fcw),
                   shift=_pad128(jnp.zeros((1, num_classes), jnp.float32)),
                   cout=num_classes)
    return P


# ---------------------------------------------------------------------------
# Block forwards
# ---------------------------------------------------------------------------

def inception_a(x, p):
    b1, b5, b3 = conv1x1_multi(x, p["stem"])
    b5 = basic_conv2d(b5, p["b5_2"], padding=2)
    b3 = basic_conv2d(b3, p["b3_2"], padding=1)
    b3 = basic_conv2d(b3, p["b3_3"], padding=1)
    bp = pool2d(x, "avg", 3, 1, 1)
    bp = basic_conv2d(bp, p["bp"])
    return jnp.concatenate([b1, b5, b3, bp], axis=-1)


def inception_b(x, p):
    b3 = basic_conv2d(x, p["b3"], stride=2)
    d = basic_conv2d(x, p["d1"])
    d = basic_conv2d(d, p["d2"], padding=1)
    d = basic_conv2d(d, p["d3"], stride=2)
    bp = pool2d(x, "max", 3, 2, 0)
    return jnp.concatenate([b3, d, bp], axis=-1)


def inception_c(x, p):
    b1, b7, bd = conv1x1_multi(x, p["stem"])
    b7 = basic_conv2d(b7, p["b7_2"], padding=(0, 3))
    b7 = basic_conv2d(b7, p["b7_3"], padding=(3, 0))
    bd = basic_conv2d(bd, p["bd_2"], padding=(3, 0))
    bd = basic_conv2d(bd, p["bd_3"], padding=(0, 3))
    bd = basic_conv2d(bd, p["bd_4"], padding=(3, 0))
    bd = basic_conv2d(bd, p["bd_5"], padding=(0, 3))
    bp = pool2d(x, "avg", 3, 1, 1)
    bp = basic_conv2d(bp, p["bp"])
    return jnp.concatenate([b1, b7, bd, bp], axis=-1)


def inception_d(x, p):
    b3, b7 = conv1x1_multi(x, p["stem"])
    b3 = basic_conv2d(b3, p["b3_2"], stride=2)
    b7 = basic_conv2d(b7, p["b7_2"], padding=(0, 3))
    b7 = basic_conv2d(b7, p["b7_3"], padding=(3, 0))
    b7 = basic_conv2d(b7, p["b7_4"], stride=2)
    bp = pool2d(x, "max", 3, 2, 0)
    return jnp.concatenate([b3, b7, bp], axis=-1)


def inception_e(x, p):
    b1, b3, bd = conv1x1_multi(x, p["stem"])
    b3 = jnp.concatenate(
        [basic_conv2d(b3, p["b3_2a"], padding=(0, 1)),
         basic_conv2d(b3, p["b3_2b"], padding=(1, 0))], axis=-1)
    bd = basic_conv2d(bd, p["bd_2"], padding=1)
    bd = jnp.concatenate(
        [basic_conv2d(bd, p["bd_3a"], padding=(0, 1)),
         basic_conv2d(bd, p["bd_3b"], padding=(1, 0))], axis=-1)
    bp = pool2d(x, "avg", 3, 1, 1)
    bp = basic_conv2d(bp, p["bp"])
    return jnp.concatenate([b1, b3, bd, bp], axis=-1)


# ---------------------------------------------------------------------------
# Full model forward
# ---------------------------------------------------------------------------

def inception_v3_forward(x_nchw, P):
    # Input is NCHW (PyTorch); work internally in NHWC bf16.
    x = jnp.transpose(x_nchw, (0, 2, 3, 1)).astype(jnp.bfloat16)

    x = basic_conv2d(x, P["c1a"], stride=2)
    x = basic_conv2d(x, P["c2a"])
    x = basic_conv2d(x, P["c2b"], padding=1)
    x = pool2d(x, "max", 3, 2, 0)
    x = basic_conv2d(x, P["c3b"])
    x = basic_conv2d(x, P["c4a"])
    x = pool2d(x, "max", 3, 2, 0)

    x = inception_a(x, P["m5b"])
    x = inception_a(x, P["m5c"])
    x = inception_a(x, P["m5d"])
    x = inception_b(x, P["m6a"])
    x = inception_c(x, P["m6b"])
    x = inception_c(x, P["m6c"])
    x = inception_c(x, P["m6d"])
    x = inception_c(x, P["m6e"])
    x = inception_d(x, P["m7a"])
    x = inception_e(x, P["m7b"])
    x = inception_e(x, P["m7c"])

    # Global average pool ('avg') + flatten (spatial is 1x1 here, so this is
    # just a reshape-level op), then the FC classifier through the same Pallas
    # matmul kernel (no ReLU, f32 output).
    feat = jnp.mean(x.astype(jnp.float32), axis=(1, 2))          # (N, 2048)
    logits = matmul_bias_act(feat, P["fc"]["w2d"], P["fc"]["shift"],
                             P["fc"]["cout"], relu=False, out_dtype=jnp.float32)
    # drop_rate=0.0 -> dropout is a no-op; aux_logits=False -> no aux head.
    return logits


# ---------------------------------------------------------------------------
# Main
# ---------------------------------------------------------------------------

if __name__ == "__main__":
    # Smallest spatial size that survives all InceptionV3 downsampling stages:
    # 75 -> 37 -> 35 -> 17 -> 15 -> 7 -> 3 -> 1.
    key = jax.random.PRNGKey(0)
    x = jax.random.normal(key, (2, 3, 75, 75), jnp.float32)  # NCHW input

    params = make_inception_v3_params(num_classes=16, in_chans=3, seed=0)
    logits = inception_v3_forward(x, params)
    logits = jax.block_until_ready(logits)
    assert logits.shape == (2, 16)
    assert bool(jnp.all(jnp.isfinite(logits)))
    print("KERNEL_OK")
</pallas_src>

<mosaic_0001>
module attributes {stable_mosaic.version = 11 : i64} {
  func.func @_mm_relu_kernel(%arg0: i32, %arg1: i32, %arg2: memref<512x27xbf16, #tpu.memory_space<vmem>>, %arg3: memref<27x128xbf16, #tpu.memory_space<vmem>>, %arg4: memref<1x128xf32, #tpu.memory_space<vmem>>, %arg5: memref<512x128xbf16, #tpu.memory_space<vmem>>) attributes {dimension_semantics = [#tpu.dimension_semantics<parallel>, #tpu.dimension_semantics<parallel>], iteration_bounds = array<i64: 1, 6>, scalar_prefetch = 0 : i64, scratch_operands = 0 : i64, tpu.core_type = #tpu.core_type<tc>, window_params = [{transform_indices = @transform_0, window_bounds = array<i64: 512, 27>}, {transform_indices = @transform_1, window_bounds = array<i64: 27, 128>}, {transform_indices = @transform_2, window_bounds = array<i64: 1, 128>}, {transform_indices = @transform_3, window_bounds = array<i64: 512, 128>}]} {
    %c0 = arith.constant 0 : index
    %c0_0 = arith.constant 0 : index
    %0 = vector.load %arg2[%c0, %c0_0] : memref<512x27xbf16, #tpu.memory_space<vmem>>, vector<512x27xbf16>
    %c0_1 = arith.constant 0 : index
    %c0_2 = arith.constant 0 : index
    %1 = vector.load %arg3[%c0_1, %c0_2] : memref<27x128xbf16, #tpu.memory_space<vmem>>, vector<27x128xbf16>
    %cst = arith.constant dense<0.000000e+00> : vector<512x128xf32>
    %2 = tpu.matmul %0, %1, %cst {dimension_numbers = #tpu.dot_dimension_numbers<[1], [0], [0], [1], [0, 0, 1, 1], [], []>} : vector<512x27xbf16>, vector<27x128xbf16>, vector<512x128xf32> -> vector<512x128xf32>
    %c0_3 = arith.constant 0 : index
    %c0_4 = arith.constant 0 : index
    %3 = vector.load %arg4[%c0_3, %c0_4] : memref<1x128xf32, #tpu.memory_space<vmem>>, vector<1x128xf32>
    %4 = vector.broadcast %3 : vector<1x128xf32> to vector<512x128xf32>
    %5 = arith.addf %2, %4 : vector<512x128xf32>
    %cst_5 = arith.constant 0.000000e+00 : f32
    %6 = vector.broadcast %cst_5 : f32 to vector<512x128xf32>
    %7 = arith.maximumf %5, %6 : vector<512x128xf32>
    %8 = arith.truncf %7 : vector<512x128xf32> to vector<512x128xbf16>
    %c0_6 = arith.constant 0 : index
    %c0_7 = arith.constant 0 : index
    %9 = vector.load %arg5[%c0_6, %c0_7] : memref<512x128xbf16, #tpu.memory_space<vmem>>, vector<512x128xbf16>
    tpu.vector_store %arg5[%c0_6, %c0_7], %8 {strides = array<i32>} : memref<512x128xbf16, #tpu.memory_space<vmem>>, vector<512x128xbf16>,
    return
  }
  func.func @transform_0(%arg0: i32, %arg1: i32) -> (i32, i32) {
    %c0_i32 = arith.constant 0 : i32
    %c0_i32_0 = arith.constant 0 : i32
    return %arg1, %c0_i32 : i32, i32
  }
  func.func @transform_1(%arg0: i32, %arg1: i32) -> (i32, i32) {
    %c0_i32 = arith.constant 0 : i32
    %c0_i32_0 = arith.constant 0 : i32
    return %c0_i32, %arg0 : i32, i32
  }
  func.func @transform_2(%arg0: i32, %arg1: i32) -> (i32, i32) {
    %c0_i32 = arith.constant 0 : i32
    %c0_i32_0 = arith.constant 0 : i32
    return %c0_i32, %arg0 : i32, i32
  }
  func.func @transform_3(%arg0: i32, %arg1: i32) -> (i32, i32) {
    %c0_i32 = arith.constant 0 : i32
    return %arg1, %arg0 : i32, i32
  }
}

</mosaic_0001>

<bundles_post_ra>
// kernel: tpu_custom_call.1
= control target key start
LH: loop header
LB: loop body
LE: loop exit
PB: predicated region body
PF: predicated region fallthrough
CT: control target
= control target key end

     0   :  { %s1984_s12 = smov 0   ;;  %s1986_s13 = smov 0   ;;  %s2361_s0 = inlined_call_operand.vmem [shape: bf16[2738,27], index: 0, kind: input, shape index: {}]   ;;  %s2362_s1 = inlined_call_operand.vmem [shape: bf16[27,128], index: 1, kind: input, shape index: {}]   ;;  %s2363_s2 = inlined_call_operand.vmem [shape: f32[1,128], index: 2, kind: input, shape index: {}]   ;;  %s2364_s3 = inlined_call_operand.vmem [shape: bf16[2738,32], index: 3, kind: output, shape index: {}]  }
   0x1   :  { %s1988_s14 = smov 0   ;;  %s1990_s15 = smov 0  }
   0x2   :  { %s1992_s16 = smov 0  }
   0x3 LB: > { %s1324_s17 = sadd.s32 4294967295, %s1929_s16   ;;  %s22_s18 = sadd.s32 1, %s1925_s15  ;;  %s1929_s16 = sphi %s1992_s16, %s13_s16   ;;  %s1925_s15 = sphi %s1990_s15, %s2374_s15   ;;  %s1921_s14 = sphi %s1988_s14, %s2373_s14   ;;  %s1917_s13 = sphi %s1986_s13, %s2372_s13   ;;  %s1913_s12 = sphi %s1984_s12, %s2371_s12  }
   0x4   : > { %p23_p0 = scmp.ge.s32.totalorder %s22_s18, 6  ;;  %s112_s19 = sadd.s32 1, %s1917_s13 }
   0x5   : > { %p122_p1 = scmp.ne.s32.totalorder %s1917_s13, %s1913_s12  ;;  %p123_p2 = scmp.eq.s32.totalorder %s1324_s17, 5 }
   0x6   : > { %s2376_s18 = smov (%p23_p0, %s22_s18), 0  ;;  %p1330_p4 = scmp.ge.s32.totalorder %s1929_s16, 1 }
   0x7   : > { %p2016_p3 = por %p123_p2, %p122_p1  ;;  %s107_s21 = ssub.s32 %s1925_s15, %s2376_s18 }
   0x8   : > { %p177_p5 = scmp.lt.s32.totalorder %s1929_s16, 7  ;;  %p110_p6 = scmp.eq.s32.totalorder %s107_s21, 0 }
   0xa   : > { %p178_p7 = pnand %p1330_p4, %p177_p5 }
   0xb   : > { %s2025_s22 = scalar_select %p110_p6, %s1917_s13, %s112_s19  }
   0xc   : > { %181 = sbr.rel (%p178_p7) target bundleno = 355 (0x163), region = 32  ;;  %s2034_s27 = sshll.u32 (!%p178_p7), %s1921_s14, 6 }
   0xd   : > { %p216_p8 = scmp.lt.s32.totalorder (!%p178_p7), %s2034_s27, 342  ;;  %s208_s10 = sand.u32 (!%p178_p7), 1, %s1913_s12  }
   0xe   : > { %s1331_s11 = sshll.u32 (!%p178_p7), %s208_s10, 8 }
   0xf   : > { %s2122_s12 = scalar_lea.vmem (!%p178_p7), [#allocation2], %s1331_s11  }
  0x11   : > { %v1468_v0 = vld [vmem:[%s2362_s1 + $0x8] sm:$0xf]  ;;  %v1552_v1 = vld [vmem:[%s2362_s1 + $0x8] sm:$0x30]  ;;  %vm578_vm0 = vcmask 1044480   ;;  %vm579_vm1 = vcmask 1045504  }
  0x12   : > { %v1469_v2 = vor.u32 %v1552_v1, %v1468_v0  ;;  %v1963_v3 = vmov 65535   ;;  %s217_s28 = scalar_select %p216_p8, %s2034_s27, 342  ;;  %v1551_v7 = vld [vmem:[%s2362_s1] sm:$0xff]  ;;  %vm481_vm2 = vcmask 220160  }
  0x13   : > { %v580_v4 = vsel %vm578_vm0, 4294967295, %v1963_v3  ;;  %v2113_v42 = vld [vmem:[%s2363_s2] ss:$0 sm:$0xff]  ;;  %s954_s17 = ssub.s32 (%p2016_p3), 343, %s2034_s27  ;;  %s1553_s19 = sshll.u32 (%p2016_p3), %s1921_s14, 8 }
  0x14   : > { %v581_v5 = vsel %vm579_vm1, %v580_v4, 0  ;;  %s1333_s4 = sshll.u32 %s217_s28, 2  ;;  %p955_p9 = scmp.lt.s32.totalorder (%p2016_p3), %s954_s17, 64 }
  0x15   : > { %v583_v6 = vand.u32 %v1469_v2, %v581_v5  ;;  %s2044_s7 = scalar_lea.vmem %s2361_s0, %s1333_s4  ;;  %s2221_s24 = scalar_lea.vmem (%p2016_p3), %s2364_s3, %s1553_s19  }
  0x16   : > { %v1519_v8 = vld [vmem:[%s2044_s7] sm:$0xff]  ;;  %v1520_v12 = vld [vmem:[%s2044_s7 + $0x8] sm:$0xff]  ;;  %v1521_v16 = vld [vmem:[%s2044_s7 + $0x10] sm:$0xff] }
  0x17   : > { %591 = vmatpush.bf16.msra.mxu0 %v583_v6  ;;  %1747 = vmatpush.bf16.msra.mxu1 %v583_v6  ;;  %v1527_v9 = vld [vmem:[%s2044_s7 + $0x40] sm:$0xff]  ;;  %v1528_v13 = vld [vmem:[%s2044_s7 + $0x48] sm:$0xff]  ;;  %v1529_v17 = vld [vmem:[%s2044_s7 + $0x50] sm:$0xff] }
  0x18   : > { %1748 = vmatpush.bf16.msra.mxu2 %v583_v6  ;;  %1749 = vmatpush.bf16.msra.mxu3 %v583_v6  ;;  %v1535_v10 = vld [vmem:[%s2044_s7 + $0x80] sm:$0xff]  ;;  %v1536_v14 = vld [vmem:[%s2044_s7 + $0x88] sm:$0xff]  ;;  %v1537_v18 = vld [vmem:[%s2044_s7 + $0x90] sm:$0xff] }
  0x19   : > { %v1543_v11 = vld [vmem:[%s2044_s7 + $0xc0] sm:$0xff]  ;;  %v1544_v15 = vld [vmem:[%s2044_s7 + $0xc8] sm:$0xff]  ;;  %v1545_v19 = vld [vmem:[%s2044_s7 + $0xd0] sm:$0xff] }
  0x1a   : > { %v1522_v20 = vld [vmem:[%s2044_s7 + $0x18] sm:$0xff]  ;;  %v1523_v24 = vld [vmem:[%s2044_s7 + $0x20] sm:$0xff]  ;;  %v1524_v28 = vld [vmem:[%s2044_s7 + $0x28] sm:$0xff] }
  0x1b   : > { %592 = vmatpush.bf16.msra.mxu0 %v1551_v7  ;;  %1750 = vmatpush.bf16.msra.mxu1 %v1551_v7  ;;  %v1530_v21 = vld [vmem:[%s2044_s7 + $0x58] sm:$0xff]  ;;  %v1531_v25 = vld [vmem:[%s2044_s7 + $0x60] sm:$0xff]  ;;  %v1532_v29 = vld [vmem:[%s2044_s7 + $0x68] sm:$0xff] }
  0x1c   : > { %1751 = vmatpush.bf16.msra.mxu2 %v1551_v7  ;;  %1752 = vmatpush.bf16.msra.mxu3 %v1551_v7  ;;  %v1538_v22 = vld [vmem:[%s2044_s7 + $0x98] sm:$0xff]  ;;  %v1539_v26 = vld [vmem:[%s2044_s7 + $0xa0] sm:$0xff]  ;;  %v1540_v30 = vld [vmem:[%s2044_s7 + $0xa8] sm:$0xff] }
  0x1d   : > { %v1546_v23 = vld [vmem:[%s2044_s7 + $0xd8] sm:$0xff]  ;;  %v1547_v27 = vld [vmem:[%s2044_s7 + $0xe0] sm:$0xff]  ;;  %v1548_v31 = vld [vmem:[%s2044_s7 + $0xe8] sm:$0xff] }
  0x1e   : > { %1470 = vmatmul.msk.bf16.vlgmr.msra.gmra.mxu0 %vm481_vm2, %v1519_v8  ;;  %1478 = vmatmul.msk.bf16.vlgmr.msra.gmra.mxu1 %vm481_vm2, %v1527_v9  ;;  %v1525_v32 = vld [vmem:[%s2044_s7 + $0x30] sm:$0xff]  ;;  %v1526_v36 = vld [vmem:[%s2044_s7 + $0x38] sm:$0xff] }
  0x1f   : > { %1486 = vmatmul.msk.bf16.vlgmr.msra.gmra.mxu2 %vm481_vm2, %v1535_v10  ;;  %1494 = vmatmul.msk.bf16.vlgmr.msra.gmra.mxu3 %vm481_vm2, %v1543_v11  ;;  %v1533_v33 = vld [vmem:[%s2044_s7 + $0x70] sm:$0xff]  ;;  %v1534_v37 = vld [vmem:[%s2044_s7 + $0x78] sm:$0xff] }
  0x20   : > { %v1541_v34 = vld [vmem:[%s2044_s7 + $0xb0] sm:$0xff]  ;;  %v1542_v38 = vld [vmem:[%s2044_s7 + $0xb8] sm:$0xff] }
  0x21   : > { %v1549_v35 = vld [vmem:[%s2044_s7 + $0xf0] sm:$0xff]  ;;  %v1550_v39 = vld [vmem:[%s2044_s7 + $0xf8] sm:$0xff] }
  0x2e   : > { %1471 = vmatmul.msk.bf16.gmra.mxu0 %vm481_vm2, %v1520_v12  ;;  %1479 = vmatmul.msk.bf16.gmra.mxu1 %vm481_vm2, %v1528_v13 }
  0x2f   : > { %1487 = vmatmul.msk.bf16.gmra.mxu2 %vm481_vm2, %v1536_v14  ;;  %1495 = vmatmul.msk.bf16.gmra.mxu3 %vm481_vm2, %v1544_v15 }
  0x3e   : > { %1472 = vmatmul.msk.bf16.gmra.mxu0 %vm481_vm2, %v1521_v16  ;;  %1480 = vmatmul.msk.bf16.gmra.mxu1 %vm481_vm2, %v1529_v17 }
  0x3f   : > { %1488 = vmatmul.msk.bf16.gmra.mxu2 %vm481_vm2, %v1537_v18  ;;  %1496 = vmatmul.msk.bf16.gmra.mxu3 %vm481_vm2, %v1545_v19 }
  0x4e   : > { %1473 = vmatmul.msk.bf16.gmra.mxu0 %vm481_vm2, %v1522_v20  ;;  %1481 = vmatmul.msk.bf16.gmra.mxu1 %vm481_vm2, %v1530_v21 }
  0x4f   : > { %1489 = vmatmul.msk.bf16.gmra.mxu2 %vm481_vm2, %v1538_v22  ;;  %1497 = vmatmul.msk.bf16.gmra.mxu3 %vm481_vm2, %v1546_v23 }
  0x5e   : > { %1474 = vmatmul.msk.bf16.gmra.mxu0 %vm481_vm2, %v1523_v24  ;;  %1482 = vmatmul.msk.bf16.gmra.mxu1 %vm481_vm2, %v1531_v25 }
  0x5f   : > { %1490 = vmatmul.msk.bf16.gmra.mxu2 %vm481_vm2, %v1539_v26  ;;  %1498 = vmatmul.msk.bf16.gmra.mxu3 %vm481_vm2, %v1547_v27 }
  0x6e   : > { %1475 = vmatmul.msk.bf16.gmra.mxu0 %vm481_vm2, %v1524_v28  ;;  %1483 = vmatmul.msk.bf16.gmra.mxu1 %vm481_vm2, %v1532_v29 }
  0x6f   : > { %1491 = vmatmul.msk.bf16.gmra.mxu2 %vm481_vm2, %v1540_v30  ;;  %1499 = vmatmul.msk.bf16.gmra.mxu3 %vm481_vm2, %v1548_v31 }
  0x7e   : > { %1476 = vmatmul.msk.bf16.gmra.mxu0 %vm481_vm2, %v1525_v32  ;;  %1484 = vmatmul.msk.bf16.gmra.mxu1 %vm481_vm2, %v1533_v33 }
  0x7f   : > { %1492 = vmatmul.msk.bf16.gmra.mxu2 %vm481_vm2, %v1541_v34  ;;  %1500 = vmatmul.msk.bf16.gmra.mxu3 %vm481_vm2, %v1549_v35 }
  0x8e   : > { %1477 = vmatmul.msk.bf16.gmra.mxu0 %vm481_vm2, %v1526_v36  ;;  %1485 = vmatmul.msk.bf16.gmra.mxu1 %vm481_vm2, %v1534_v37 }
  0x8f   : > { %1493 = vmatmul.msk.bf16.gmra.mxu2 %vm481_vm2, %v1542_v38  ;;  %1501 = vmatmul.msk.bf16.gmra.mxu3 %vm481_vm2, %v1550_v39 }
  0x9b   : > { %v594_v40 = vpop.f32.mrf.mxu0  ;;  %v634_v41 = vpop.f32.mrf.mxu1 }
  0x9c   : > { %v595_v43 = vadd.f32 %v2113_v42, %v594_v40  ;;  %v635_v44 = vadd.f32 %v2113_v42, %v634_v41 }
  0x9e   : > { %v754_v51 = vmax.f32 %v595_v43, 0.0  ;;  %v770_v52 = vmax.f32 %v635_v44, 0.0 }
  0xa2   : > { %v674_v45 = vpop.f32.mrf.mxu2  ;;  %v714_v46 = vpop.f32.mrf.mxu3 }
  0xa3   : > { %v596_v47 = vpop.f32.mrf.mxu0  ;;  %v636_v48 = vpop.f32.mrf.mxu1  ;;  %v675_v57 = vadd.f32 %v2113_v42, %v674_v45  ;;  %v715_v58 = vadd.f32 %v2113_v42, %v714_v46 }
  0xa4   : > { %v597_v49 = vadd.f32 %v2113_v42, %v596_v47  ;;  %v637_v50 = vadd.f32 %v2113_v42, %v636_v48 }
  0xa5   : > { %v786_v1 = vmax.f32 %v675_v57, 0.0  ;;  %v802_v2 = vmax.f32 %v715_v58, 0.0 }
  0xa6   : > { %v755_v53 = vmax.f32 %v597_v49, 0.0  ;;  %v771_v54 = vmax.f32 %v637_v50, 0.0 }
  0xa8   : > { %v1559_v55 = vpack.c.bf16 %v755_v53, %v754_v51  ;;  %v1599_v56 = vpack.c.bf16 %v771_v54, %v770_v52 }
  0xaa   : > { %1560 = vst [vmem:[%s2122_s12] sm:$0xff] %v1559_v55   ;;  %v676_v59 = vpop.f32.mrf.mxu2  ;;  %v716_v60 = vpop.f32.mrf.mxu3 }
  0xab   : > { %1723 = vst [vmem:[%s2122_s12 + $0x40] sm:$0xff] %v1599_v56   ;;  %v677_v61 = vadd.f32 %v2113_v42, %v676_v59  ;;  %v717_v62 = vadd.f32 %v2113_v42, %v716_v60  ;;  %v599_v63 = vpop.f32.mrf.mxu0  ;;  %v639_v0 = vpop.f32.mrf.mxu1 }
  0xac   : > { %v600_v7 = vadd.f32 %v2113_v42, %v599_v63  ;;  %v640_v8 = vadd.f32 %v2113_v42, %v639_v0 }
  0xad   : > { %v787_v3 = vmax.f32 %v677_v61, 0.0  ;;  %v803_v4 = vmax.f32 %v717_v62, 0.0 }
  0xae   : > { %v756_v15 = vmax.f32 %v600_v7, 0.0  ;;  %v772_v16 = vmax.f32 %v640_v8, 0.0 }
  0xaf   : > { %v1639_v5 = vpack.c.bf16 %v787_v3, %v786_v1  ;;  %v1679_v6 = vpack.c.bf16 %v803_v4, %v802_v2 }
  0xb1   : > { %1731 = vst [vmem:[%s2122_s12 + $0x80] sm:$0xff] %v1639_v5  }
  0xb2   : > { %1739 = vst [vmem:[%s2122_s12 + $0xc0] sm:$0xff] %v1679_v6   ;;  %v679_v9 = vpop.f32.mrf.mxu2  ;;  %v719_v10 = vpop.f32.mrf.mxu3 }
  0xb3   : > { %v601_v11 = vpop.f32.mrf.mxu0  ;;  %v641_v12 = vpop.f32.mrf.mxu1  ;;  %v680_v21 = vadd.f32 %v2113_v42, %v679_v9  ;;  %v720_v22 = vadd.f32 %v2113_v42, %v719_v10 }
  0xb4   : > { %v602_v13 = vadd.f32 %v2113_v42, %v601_v11  ;;  %v642_v14 = vadd.f32 %v2113_v42, %v641_v12 }
  0xb5   : > { %v788_v29 = vmax.f32 %v680_v21, 0.0  ;;  %v804_v30 = vmax.f32 %v720_v22, 0.0 }
  0xb6   : > { %v757_v17 = vmax.f32 %v602_v13, 0.0  ;;  %v773_v18 = vmax.f32 %v642_v14, 0.0 }
  0xb8   : > { %v1564_v19 = vpack.c.bf16 %v757_v17, %v756_v15  ;;  %v1604_v20 = vpack.c.bf16 %v773_v18, %v772_v16 }
  0xba   : > { %1716 = vst [vmem:[%s2122_s12 + $0x8] sm:$0xff] %v1564_v19   ;;  %v681_v23 = vpop.f32.mrf.mxu2  ;;  %v721_v24 = vpop.f32.mrf.mxu3 }
  0xbb   : > { %1724 = vst [vmem:[%s2122_s12 + $0x48] sm:$0xff] %v1604_v20   ;;  %v682_v25 = vadd.f32 %v2113_v42, %v681_v23  ;;  %v722_v26 = vadd.f32 %v2113_v42, %v721_v24  ;;  %v604_v27 = vpop.f32.mrf.mxu0  ;;  %v644_v28 = vpop.f32.mrf.mxu1 }
  0xbc   : > { %v605_v35 = vadd.f32 %v2113_v42, %v604_v27  ;;  %v645_v36 = vadd.f32 %v2113_v42, %v644_v28 }
  0xbd   : > { %v789_v31 = vmax.f32 %v682_v25, 0.0  ;;  %v805_v32 = vmax.f32 %v722_v26, 0.0 }
  0xbe   : > { %v758_v44 = vmax.f32 %v605_v35, 0.0  ;;  %v774_v45 = vmax.f32 %v645_v36, 0.0 }
  0xbf   : > { %v1644_v33 = vpack.c.bf16 %v789_v31, %v788_v29  ;;  %v1684_v34 = vpack.c.bf16 %v805_v32, %v804_v30 }
  0xc1   : > { %1732 = vst [vmem:[%s2122_s12 + $0x88] sm:$0xff] %v1644_v33  }
  0xc2   : > { %1740 = vst [vmem:[%s2122_s12 + $0xc8] sm:$0xff] %v1684_v34   ;;  %v684_v37 = vpop.f32.mrf.mxu2  ;;  %v724_v38 = vpop.f32.mrf.mxu3 }
  0xc3   : > { %v606_v39 = vpop.f32.mrf.mxu0  ;;  %v646_v40 = vpop.f32.mrf.mxu1  ;;  %v685_v50 = vadd.f32 %v2113_v42, %v684_v37  ;;  %v725_v51 = vadd.f32 %v2113_v42, %v724_v38 }
  0xc4   : > { %v607_v41 = vadd.f32 %v2113_v42, %v606_v39  ;;  %v647_v43 = vadd.f32 %v2113_v42, %v646_v40 }
  0xc5   : > { %v790_v58 = vmax.f32 %v685_v50, 0.0  ;;  %v806_v59 = vmax.f32 %v725_v51, 0.0 }
  0xc6   : > { %v759_v46 = vmax.f32 %v607_v41, 0.0  ;;  %v775_v47 = vmax.f32 %v647_v43, 0.0 }
  0xc8   : > { %v1569_v48 = vpack.c.bf16 %v759_v46, %v758_v44  ;;  %v1609_v49 = vpack.c.bf16 %v775_v47, %v774_v45 }
  0xca   : > { %1717 = vst [vmem:[%s2122_s12 + $0x10] sm:$0xff] %v1569_v48   ;;  %v686_v52 = vpop.f32.mrf.mxu2  ;;  %v726_v53 = vpop.f32.mrf.mxu3 }
  0xcb   : > { %1725 = vst [vmem:[%s2122_s12 + $0x50] sm:$0xff] %v1609_v49   ;;  %v687_v54 = vadd.f32 %v2113_v42, %v686_v52  ;;  %v727_v55 = vadd.f32 %v2113_v42, %v726_v53  ;;  %v609_v56 = vpop.f32.mrf.mxu0  ;;  %v649_v57 = vpop.f32.mrf.mxu1 }
  0xcc   : > { %v610_v0 = vadd.f32 %v2113_v42, %v609_v56  ;;  %v650_v1 = vadd.f32 %v2113_v42, %v649_v57 }
  0xcd   : > { %v791_v60 = vmax.f32 %v687_v54, 0.0  ;;  %v807_v61 = vmax.f32 %v727_v55, 0.0 }
  0xce   : > { %v760_v8 = vmax.f32 %v610_v0, 0.0  ;;  %v776_v9 = vmax.f32 %v650_v1, 0.0 }
  0xcf   : > { %v1649_v62 = vpack.c.bf16 %v791_v60, %v790_v58  ;;  %v1689_v63 = vpack.c.bf16 %v807_v61, %v806_v59 }
  0xd1   : > { %1733 = vst [vmem:[%s2122_s12 + $0x90] sm:$0xff] %v1649_v62  }
  0xd2   : > { %1741 = vst [vmem:[%s2122_s12 + $0xd0] sm:$0xff] %v1689_v63   ;;  %v689_v2 = vpop.f32.mrf.mxu2  ;;  %v729_v3 = vpop.f32.mrf.mxu3 }
  0xd3   : > { %v611_v4 = vpop.f32.mrf.mxu0  ;;  %v651_v5 = vpop.f32.mrf.mxu1  ;;  %v690_v14 = vadd.f32 %v2113_v42, %v689_v2  ;;  %v730_v15 = vadd.f32 %v2113_v42, %v729_v3 }
  0xd4   : > { %v612_v6 = vadd.f32 %v2113_v42, %v611_v4  ;;  %v652_v7 = vadd.f32 %v2113_v42, %v651_v5 }
  0xd5   : > { %v792_v22 = vmax.f32 %v690_v14, 0.0  ;;  %v808_v23 = vmax.f32 %v730_v15, 0.0 }
  0xd6   : > { %v761_v10 = vmax.f32 %v612_v6, 0.0  ;;  %v777_v11 = vmax.f32 %v652_v7, 0.0 }
  0xd8   : > { %v1574_v12 = vpack.c.bf16 %v761_v10, %v760_v8  ;;  %v1614_v13 = vpack.c.bf16 %v777_v11, %v776_v9 }
  0xda   : > { %1718 = vst [vmem:[%s2122_s12 + $0x18] sm:$0xff] %v1574_v12   ;;  %v691_v16 = vpop.f32.mrf.mxu2  ;;  %v731_v17 = vpop.f32.mrf.mxu3 }
  0xdb   : > { %1726 = vst [vmem:[%s2122_s12 + $0x58] sm:$0xff] %v1614_v13   ;;  %v692_v18 = vadd.f32 %v2113_v42, %v691_v16  ;;  %v732_v19 = vadd.f32 %v2113_v42, %v731_v17  ;;  %v614_v20 = vpop.f32.mrf.mxu0  ;;  %v654_v21 = vpop.f32.mrf.mxu1 }
  0xdc   : > { %v615_v28 = vadd.f32 %v2113_v42, %v614_v20  ;;  %v655_v29 = vadd.f32 %v2113_v42, %v654_v21 }
  0xdd   : > { %v793_v24 = vmax.f32 %v692_v18, 0.0  ;;  %v809_v25 = vmax.f32 %v732_v19, 0.0 }
  0xde   : > { %v762_v36 = vmax.f32 %v615_v28, 0.0  ;;  %v778_v37 = vmax.f32 %v655_v29, 0.0 }
  0xdf   : > { %v1654_v26 = vpack.c.bf16 %v793_v24, %v792_v22  ;;  %v1694_v27 = vpack.c.bf16 %v809_v25, %v808_v23 }
  0xe1   : > { %1734 = vst [vmem:[%s2122_s12 + $0x98] sm:$0xff] %v1654_v26  }
  0xe2   : > { %1742 = vst [vmem:[%s2122_s12 + $0xd8] sm:$0xff] %v1694_v27   ;;  %v694_v30 = vpop.f32.mrf.mxu2  ;;  %v734_v31 = vpop.f32.mrf.mxu3 }
  0xe3   : > { %v616_v32 = vpop.f32.mrf.mxu0  ;;  %v656_v33 = vpop.f32.mrf.mxu1  ;;  %v695_v43 = vadd.f32 %v2113_v42, %v694_v30  ;;  %v735_v44 = vadd.f32 %v2113_v42, %v734_v31 }
  0xe4   : > { %v617_v34 = vadd.f32 %v2113_v42, %v616_v32  ;;  %v657_v35 = vadd.f32 %v2113_v42, %v656_v33 }
  0xe5   : > { %v794_v51 = vmax.f32 %v695_v43, 0.0  ;;  %v810_v52 = vmax.f32 %v735_v44, 0.0 }
  0xe6   : > { %v763_v38 = vmax.f32 %v617_v34, 0.0  ;;  %v779_v39 = vmax.f32 %v657_v35, 0.0 }
  0xe8   : > { %v1579_v40 = vpack.c.bf16 %v763_v38, %v762_v36  ;;  %v1619_v41 = vpack.c.bf16 %v779_v39, %v778_v37 }
  0xea   : > { %1719 = vst [vmem:[%s2122_s12 + $0x20] sm:$0xff] %v1579_v40   ;;  %v696_v45 = vpop.f32.mrf.mxu2  ;;  %v736_v46 = vpop.f32.mrf.mxu3 }
  0xeb   : > { %1727 = vst [vmem:[%s2122_s12 + $0x60] sm:$0xff] %v1619_v41   ;;  %v697_v47 = vadd.f32 %v2113_v42, %v696_v45  ;;  %v737_v48 = vadd.f32 %v2113_v42, %v736_v46  ;;  %v619_v49 = vpop.f32.mrf.mxu0  ;;  %v659_v50 = vpop.f32.mrf.mxu1 }
  0xec   : > { %v620_v57 = vadd.f32 %v2113_v42, %v619_v49  ;;  %v660_v58 = vadd.f32 %v2113_v42, %v659_v50 }
  0xed   : > { %v795_v53 = vmax.f32 %v697_v47, 0.0  ;;  %v811_v54 = vmax.f32 %v737_v48, 0.0 }
  0xee   : > { %v764_v1 = vmax.f32 %v620_v57, 0.0  ;;  %v780_v2 = vmax.f32 %v660_v58, 0.0 }
  0xef   : > { %v1659_v55 = vpack.c.bf16 %v795_v53, %v794_v51  ;;  %v1699_v56 = vpack.c.bf16 %v811_v54, %v810_v52 }
  0xf1   : > { %1735 = vst [vmem:[%s2122_s12 + $0xa0] sm:$0xff] %v1659_v55  }
  0xf2   : > { %1743 = vst [vmem:[%s2122_s12 + $0xe0] sm:$0xff] %v1699_v56   ;;  %v699_v59 = vpop.f32.mrf.mxu2  ;;  %v739_v60 = vpop.f32.mrf.mxu3 }
  0xf3   : > { %v621_v61 = vpop.f32.mrf.mxu0  ;;  %v661_v62 = vpop.f32.mrf.mxu1  ;;  %v700_v7 = vadd.f32 %v2113_v42, %v699_v59  ;;  %v740_v8 = vadd.f32 %v2113_v42, %v739_v60 }
  0xf4   : > { %v622_v63 = vadd.f32 %v2113_v42, %v621_v61  ;;  %v662_v0 = vadd.f32 %v2113_v42, %v661_v62 }
  0xf5   : > { %v796_v15 = vmax.f32 %v700_v7, 0.0  ;;  %v812_v16 = vmax.f32 %v740_v8, 0.0 }
  0xf6   : > { %v765_v3 = vmax.f32 %v622_v63, 0.0  ;;  %v781_v4 = vmax.f32 %v662_v0, 0.0 }
  0xf8   : > { %v1584_v5 = vpack.c.bf16 %v765_v3, %v764_v1  ;;  %v1624_v6 = vpack.c.bf16 %v781_v4, %v780_v2 }
  0xfa   : > { %1720 = vst [vmem:[%s2122_s12 + $0x28] sm:$0xff] %v1584_v5   ;;  %v701_v9 = vpop.f32.mrf.mxu2  ;;  %v741_v10 = vpop.f32.mrf.mxu3 }
  0xfb   : > { %1728 = vst [vmem:[%s2122_s12 + $0x68] sm:$0xff] %v1624_v6   ;;  %v702_v11 = vadd.f32 %v2113_v42, %v701_v9  ;;  %v742_v12 = vadd.f32 %v2113_v42, %v741_v10  ;;  %v624_v13 = vpop.f32.mrf.mxu0  ;;  %v664_v14 = vpop.f32.mrf.mxu1 }
  0xfc   : > { %v625_v21 = vadd.f32 %v2113_v42, %v624_v13  ;;  %v665_v22 = vadd.f32 %v2113_v42, %v664_v14 }
  0xfd   : > { %v797_v17 = vmax.f32 %v702_v11, 0.0  ;;  %v813_v18 = vmax.f32 %v742_v12, 0.0 }
  0xfe   : > { %v766_v29 = vmax.f32 %v625_v21, 0.0  ;;  %v782_v30 = vmax.f32 %v665_v22, 0.0 }
  0xff   : > { %v1664_v19 = vpack.c.bf16 %v797_v17, %v796_v15  ;;  %v1704_v20 = vpack.c.bf16 %v813_v18, %v812_v16 }
 0x101   : > { %1736 = vst [vmem:[%s2122_s12 + $0xa8] sm:$0xff] %v1664_v19  }
 0x102   : > { %1744 = vst [vmem:[%s2122_s12 + $0xe8] sm:$0xff] %v1704_v20   ;;  %v704_v23 = vpop.f32.mrf.mxu2  ;;  %v744_v24 = vpop.f32.mrf.mxu3 }
 0x103   : > { %v626_v25 = vpop.f32.mrf.mxu0  ;;  %v666_v26 = vpop.f32.mrf.mxu1  ;;  %v705_v35 = vadd.f32 %v2113_v42, %v704_v23  ;;  %v745_v36 = vadd.f32 %v2113_v42, %v744_v24 }
 0x104   : > { %v627_v27 = vadd.f32 %v2113_v42, %v626_v25  ;;  %v667_v28 = vadd.f32 %v2113_v42, %v666_v26 }
 0x105   : > { %v798_v44 = vmax.f32 %v705_v35, 0.0  ;;  %v814_v45 = vmax.f32 %v745_v36, 0.0 }
 0x106   : > { %v767_v31 = vmax.f32 %v627_v27, 0.0  ;;  %v783_v32 = vmax.f32 %v667_v28, 0.0 }
 0x108   : > { %v1589_v33 = vpack.c.bf16 %v767_v31, %v766_v29  ;;  %v1629_v34 = vpack.c.bf16 %v783_v32, %v782_v30 }
 0x10a   : > { %1721 = vst [vmem:[%s2122_s12 + $0x30] sm:$0xff] %v1589_v33   ;;  %v706_v37 = vpop.f32.mrf.mxu2  ;;  %v746_v38 = vpop.f32.mrf.mxu3 }
 0x10b   : > { %1729 = vst [vmem:[%s2122_s12 + $0x70] sm:$0xff] %v1629_v34   ;;  %v707_v39 = vadd.f32 %v2113_v42, %v706_v37  ;;  %v747_v40 = vadd.f32 %v2113_v42, %v746_v38  ;;  %v629_v41 = vpop.f32.mrf.mxu0  ;;  %v669_v43 = vpop.f32.mrf.mxu1 }
 0x10c   : > { %v630_v50 = vadd.f32 %v2113_v42, %v629_v41  ;;  %v670_v51 = vadd.f32 %v2113_v42, %v669_v43 }
 0x10d   : > { %v799_v46 = vmax.f32 %v707_v39, 0.0  ;;  %v815_v47 = vmax.f32 %v747_v40, 0.0 }
 0x10e   : > { %v768_v58 = vmax.f32 %v630_v50, 0.0  ;;  %v784_v59 = vmax.f32 %v670_v51, 0.0 }
 0x10f   : > { %v1669_v48 = vpack.c.bf16 %v799_v46, %v798_v44  ;;  %v1709_v49 = vpack.c.bf16 %v815_v47, %v814_v45 }
 0x111   : > { %1737 = vst [vmem:[%s2122_s12 + $0xb0] sm:$0xff] %v1669_v48  }
 0x112   : > { %1745 = vst [vmem:[%s2122_s12 + $0xf0] sm:$0xff] %v1709_v49   ;;  %v709_v52 = vpop.f32.mrf.mxu2  ;;  %v749_v53 = vpop.f32.mrf.mxu3 }
 0x113   : > { %v631_v54 = vpop.f32.mrf.mxu0  ;;  %v671_v55 = vpop.f32.mrf.mxu1  ;;  %v710_v0 = vadd.f32 %v2113_v42, %v709_v52  ;;  %v750_v1 = vadd.f32 %v2113_v42, %v749_v53 }
 0x114   : > { %v632_v56 = vadd.f32 %v2113_v42, %v631_v54  ;;  %v672_v57 = vadd.f32 %v2113_v42, %v671_v55 }
 0x115   : > { %v800_v6 = vmax.f32 %v710_v0, 0.0  ;;  %v816_v7 = vmax.f32 %v750_v1, 0.0 }
 0x116   : > { %v769_v60 = vmax.f32 %v632_v56, 0.0  ;;  %v785_v61 = vmax.f32 %v672_v57, 0.0 }
 0x118   : > { %v1594_v62 = vpack.c.bf16 %v769_v60, %v768_v58  ;;  %v1634_v63 = vpack.c.bf16 %v785_v61, %v784_v59 }
 0x11a   : > { %1722 = vst [vmem:[%s2122_s12 + $0x38] sm:$0xff] %v1594_v62   ;;  %v711_v2 = vpop.f32.mrf.mxu2  ;;  %v751_v3 = vpop.f32.mrf.mxu3 }
 0x11b   : > { %1730 = vst [vmem:[%s2122_s12 + $0x78] sm:$0xff] %v1634_v63   ;;  %v712_v4 = vadd.f32 %v2113_v42, %v711_v2  ;;  %v752_v5 = vadd.f32 %v2113_v42, %v751_v3 }
 0x11d   : > { %v801_v8 = vmax.f32 %v712_v4, 0.0  ;;  %v817_v9 = vmax.f32 %v752_v5, 0.0 }
 0x11e   : > { %952 = sbr.rel (!%p2016_p3) target bundleno = 355 (0x163), region = 36 }
 0x11f   : > { %v1674_v10 = vpack.c.bf16 %v801_v8, %v800_v6  ;;  %v1714_v11 = vpack.c.bf16 %v817_v9, %v816_v7 }
 0x121   : > { %1738 = vst [vmem:[%s2122_s12 + $0xb8] sm:$0xff] %v1674_v10  }
 0x122   : > { %1746 = vst [vmem:[%s2122_s12 + $0xf8] sm:$0xff] %v1714_v11  }
 0x123   : > { %s2378_s17 = smov (!%p955_p9, %s954_s17), 64 }
 0x124   : > { %s1504_s25 = sshll.u32 %s2378_s17, 2 }
 0x125   : > { %p1507_p10 = scmp.eq.s32.totalorder %s1504_s25, 0 }
 0x126   : > { %s2227_s26 = sshrl.u32 (!%p1507_p10), %s2378_s17, 5 }
 0x127   : > { %964 = sbr.rel (%p1507_p10) target bundleno = 355 (0x163), region = 40  ;;  %p1508_p11 = scmp.le.s32.totalorder (!%p1507_p10), %s2227_s26, 0 }
 0x12c   : > { %1254 = sbr.rel (%p1508_p11) target bundleno = 338 (0x152), region = 118  ;;  %s2366_s14 = smov (!%p1508_p11), %s2221_s24 }
 0x12d   : > { %s2367_s20 = smov (!%p1508_p11), %s2122_s12  ;;  %s2236_s27 = smov (!%p1508_p11), 0  }
 0x12e   : > { %s2238_s28 = smov (!%p1508_p11), 0  }
 0x131 LB: >> { %v981_v42 = vld [vmem:[%s1937_s20] sm:$0xf]  ;;  %v983_v12 = vld [vmem:[%s1937_s20 + $0x4] sm:$0xf]  ;;  %v985_v13 = vld [vmem:[%s1937_s20 + $0x8] sm:$0xf]  ;;  %s1945_s28 = sphi %s2238_s28, %s975_s28   ;;  %s1941_s27 = sphi %s2236_s27, %s2370_s27   ;;  %s1937_s20 = sphi %s2367_s20, %s2369_s20   ;;  %s1933_s14 = sphi %s2366_s14, %s2368_s14  }
 0x132   : >> { %982 = vst [vmem:[%s1933_s14] sm:$0xf] %v981_v42  ;;  %v987_v14 = vld [vmem:[%s1937_s20 + $0xc] sm:$0xf]  ;;  %v989_v15 = vld [vmem:[%s1937_s20 + $0x10] sm:$0xf]  ;;  %s1045_s29 = sadd.s32 1, %s1941_s27 }
 0x133   : >> { %984 = vst [vmem:[%s1933_s14 + $0x4] sm:$0xf] %v983_v12  ;;  %v991_v16 = vld [vmem:[%s1937_s20 + $0x14] sm:$0xf]  ;;  %v993_v17 = vld [vmem:[%s1937_s20 + $0x18] sm:$0xf]  ;;  %p1046_p12 = scmp.ge.s32.totalorder %s1045_s29, %s2227_s26 }
 0x134   : >> { %986 = vst [vmem:[%s1933_s14 + $0x8] sm:$0xf] %v985_v13  ;;  %v995_v18 = vld [vmem:[%s1937_s20 + $0x1c] sm:$0xf]  ;;  %v997_v19 = vld [vmem:[%s1937_s20 + $0x20] sm:$0xf] }
 0x135   : >> { %988 = vst [vmem:[%s1933_s14 + $0xc] sm:$0xf] %v987_v14  ;;  %v999_v20 = vld [vmem:[%s1937_s20 + $0x24] sm:$0xf]  ;;  %v1001_v21 = vld [vmem:[%s1937_s20 + $0x28] sm:$0xf] }
 0x136   : >> { %990 = vst [vmem:[%s1933_s14 + $0x10] sm:$0xf] %v989_v15  ;;  %v1003_v22 = vld [vmem:[%s1937_s20 + $0x2c] sm:$0xf]  ;;  %v1005_v23 = vld [vmem:[%s1937_s20 + $0x30] sm:$0xf] }
 0x137   : >> { %992 = vst [vmem:[%s1933_s14 + $0x14] sm:$0xf] %v991_v16  ;;  %v1007_v24 = vld [vmem:[%s1937_s20 + $0x34] sm:$0xf]  ;;  %v1009_v25 = vld [vmem:[%s1937_s20 + $0x38] sm:$0xf] }
 0x138   : >> { %994 = vst [vmem:[%s1933_s14 + $0x18] sm:$0xf] %v993_v17  ;;  %v1011_v26 = vld [vmem:[%s1937_s20 + $0x3c] sm:$0xf]  ;;  %v1013_v27 = vld [vmem:[%s1937_s20 + $0x40] sm:$0xf] }
 0x139   : >> { %996 = vst [vmem:[%s1933_s14 + $0x1c] sm:$0xf] %v995_v18  ;;  %v1015_v28 = vld [vmem:[%s1937_s20 + $0x44] sm:$0xf]  ;;  %s2380_s29 = smov (%p1046_p12, %s1045_s29), 0  ;;  %s975_s28 = sadd.s32 1, %s1945_s28  }
 0x13a   : >> { %998 = vst [vmem:[%s1933_s14 + $0x20] sm:$0xf] %v997_v19  ;;  %v1017_v29 = vld [vmem:[%s1937_s20 + $0x48] sm:$0xf]  ;;  %v1019_v30 = vld [vmem:[%s1937_s20 + $0x4c] sm:$0xf]  ;;  %p974_p13 = scmp.ge.s32.totalorder %s975_s28, %s2227_s26  ;;  %s2370_s27 = smov %s2380_s29 }
 0x13b   : >> { %1000 = vst [vmem:[%s1933_s14 + $0x24] sm:$0xf] %v999_v20  ;;  %s1509_s30 = sshll.u32 %s2380_s29, 7  ;;  %v1021_v31 = vld [vmem:[%s1937_s20 + $0x50] sm:$0xf] }
 0x13c   : >> { %1002 = vst [vmem:[%s1933_s14 + $0x28] sm:$0xf] %v1001_v21  ;;  %s2297_s4 = scalar_lea.vmem %s2122_s12, %s1509_s30 [#allocation2]   ;;  %s1051_s5 = scalar_lea.vmem %s2221_s24, %s1509_s30   ;;  %v1023_v32 = vld [vmem:[%s1937_s20 + $0x54] sm:$0xf]  ;;  %v1025_v33 = vld [vmem:[%s1937_s20 + $0x58] sm:$0xf] }
 0x13d   : >> { %1004 = vst [vmem:[%s1933_s14 + $0x2c] sm:$0xf] %v1003_v22  ;;  %v1027_v34 = vld [vmem:[%s1937_s20 + $0x5c] sm:$0xf]  ;;  %v1029_v35 = vld [vmem:[%s1937_s20 + $0x60] sm:$0xf] }
 0x13e   : >> { %1006 = vst [vmem:[%s1933_s14 + $0x30] sm:$0xf] %v1005_v23  ;;  %v1031_v36 = vld [vmem:[%s1937_s20 + $0x64] sm:$0xf]  ;;  %v1033_v37 = vld [vmem:[%s1937_s20 + $0x68] sm:$0xf] }
 0x13f   : >> { %1008 = vst [vmem:[%s1933_s14 + $0x34] sm:$0xf] %v1007_v24  ;;  %v1035_v38 = vld [vmem:[%s1937_s20 + $0x6c] sm:$0xf]  ;;  %v1037_v39 = vld [vmem:[%s1937_s20 + $0x70] sm:$0xf] }
 0x140   : >> { %1010 = vst [vmem:[%s1933_s14 + $0x38] sm:$0xf] %v1009_v25  ;;  %v1039_v40 = vld [vmem:[%s1937_s20 + $0x74] sm:$0xf]  ;;  %v1041_v41 = vld [vmem:[%s1937_s20 + $0x78] sm:$0xf] }
 0x141   : >> { %1012 = vst [vmem:[%s1933_s14 + $0x3c] sm:$0xf] %v1011_v26  ;;  %v1043_v43 = vld [vmem:[%s1937_s20 + $0x7c] sm:$0xf]  ;;  %s2369_s20 = smov %s2297_s4 }
 0x142   : >> { %1014 = vst [vmem:[%s1933_s14 + $0x40] sm:$0xf] %v1013_v27 }
 0x143   : >> { %1016 = vst [vmem:[%s1933_s14 + $0x44] sm:$0xf] %v1015_v28 }
 0x144   : >> { %1018 = vst [vmem:[%s1933_s14 + $0x48] sm:$0xf] %v1017_v29 }
 0x145   : >> { %1020 = vst [vmem:[%s1933_s14 + $0x4c] sm:$0xf] %v1019_v30 }
 0x146   : >> { %1022 = vst [vmem:[%s1933_s14 + $0x50] sm:$0xf] %v1021_v31 }
 0x147   : >> { %1024 = vst [vmem:[%s1933_s14 + $0x54] sm:$0xf] %v1023_v32 }
 0x148   : >> { %1026 = vst [vmem:[%s1933_s14 + $0x58] sm:$0xf] %v1025_v33 }
 0x149   : >> { %1028 = vst [vmem:[%s1933_s14 + $0x5c] sm:$0xf] %v1027_v34 }
 0x14a   : >> { %1030 = vst [vmem:[%s1933_s14 + $0x60] sm:$0xf] %v1029_v35 }
 0x14b   : >> { %1032 = vst [vmem:[%s1933_s14 + $0x64] sm:$0xf] %v1031_v36 }
 0x14c   : >> { %1034 = vst [vmem:[%s1933_s14 + $0x68] sm:$0xf] %v1033_v37 }
 0x14d   : >> { %1036 = vst [vmem:[%s1933_s14 + $0x6c] sm:$0xf] %v1035_v38  ;;  %977 = sbr.rel (!%p974_p13) target bundleno = 305 (0x131), region = 124 }
 0x14e   : >> { %1038 = vst [vmem:[%s1933_s14 + $0x70] sm:$0xf] %v1037_v39 }
 0x14f   : >> { %1040 = vst [vmem:[%s1933_s14 + $0x74] sm:$0xf] %v1039_v40 }
 0x150   : >> { %1042 = vst [vmem:[%s1933_s14 + $0x78] sm:$0xf] %v1041_v41 }
 0x151   : >> { %1044 = vst [vmem:[%s1933_s14 + $0x7c] sm:$0xf] %v1043_v43  ;;  %s2368_s14 = smov %s1051_s5 }
 0x152 PF: > { %s2338_s6 = sand.u32 31, %s2378_s17   ;;  %s1554_s7 = sshll.u32 %s2227_s26, 7 }
 0x153   : > { %s1056_s8 = scalar_lea.vmem %s2122_s12, %s1554_s7 [#allocation2]   ;;  %s1058_s9 = scalar_lea.vmem %s2221_s24, %s1554_s7  }
 0x154   : > { %p1514_p0 = scmp.le.s32.totalorder %s2338_s6, 0 }
 0x155   : > { %s1947_s10 = smov (!%p1514_p0), %s1058_s9   ;;  %s1951_s11 = smov (!%p1514_p0), %s1056_s8  }
 0x156   : > { %1268 = sbr.rel (%p1514_p0) target bundleno = 355 (0x163), region = 129  ;;  %s1955_s19 = smov (!%p1514_p0), 0  }
 0x157   : > { %s1959_s21 = smov (!%p1514_p0), 0  }
 0x15b LB: >> { %v1068_v44 = vld [vmem:[%s1953_s11] sm:$0xf]  ;;  %s1070_s17 = sadd.s32 1, %s1957_s19  ;;  %s1062_s21 = sadd.s32 1, %s1961_s21   ;;  %s1961_s21 = sphi %s1959_s21, %s1062_s21   ;;  %s1957_s19 = sphi %s1955_s19, %s1956_s19   ;;  %s1953_s11 = sphi %s1951_s11, %s1075_s11   ;;  %s1949_s10 = sphi %s1947_s10, %s1076_s10  }
 0x15c   : >> { %1069 = vst [vmem:[%s1949_s10] sm:$0xf] %v1068_v44  ;;  %p1071_p1 = scmp.ge.s32.totalorder %s1070_s17, %s2338_s6  ;;  %p1061_p2 = scmp.ge.s32.totalorder %s1062_s21, %s2338_s6 }
 0x15e   : >> { %s2382_s17 = smov (%p1071_p1, %s1070_s17), 0  ;;  %1064 = sbr.rel (!%p1061_p2) target bundleno = 347 (0x15b), region = 135 }
 0x15f   : >> { %s1515_s12 = sshll.u32 %s2382_s17, 2  ;;  %s1956_s19 = smov %s2382_s17  }
 0x160   : >> { %s1075_s11 = scalar_lea.vmem %s1056_s8, %s1515_s12 [#allocation2]   ;;  %s1076_s10 = scalar_lea.vmem %s1058_s9, %s1515_s12  }
 0x163 PF: > { %s13_s16 = sadd.s32 1, %s1929_s16   ;;  %s2371_s12 = smov %s1917_s13 }
 0x164   : > { %p10_p3 = scmp.ge.s32.totalorder %s13_s16, 8   ;;  %s2372_s13 = smov %s2025_s22 }
 0x165   : > { %s2373_s14 = smov %s1925_s15  ;;  %s2374_s15 = smov %s2376_s18 }
 0x166   :  { %12 = sbr.rel (!%p10_p3) target bundleno = 3 (0x3), region = 146 }

</bundles_post_ra>
